<compile_context>
chip_gen: v7x
topology: tpu7x:2x2x1
jax: 0.10.0
libtpu: 0.0.40
codegen_flags: <defaults>
</compile_context>

<pallas_src>
import jax
import jax.numpy as jnp
from jax.experimental import pallas as pl
from jax.experimental.pallas import tpu as pltpu

EPS = 1e-5
_VMEM_LIMIT_BYTES = 32 * 1024 * 1024       # explicit scoped VMEM limit (safe on v5e/v6e/v7x)
_TILE_BUDGET_BYTES = 2 * 1024 * 1024       # per-buffer tile budget (double-buffered in+out fits 64 MiB)


def _spatial_tile(S, C, elem_bytes):
    """Largest spatial tile that is a multiple of 128, divides S and fits the budget."""
    if S % 128 != 0:
        return S                            # fall back to full (possibly masked) extent
    bpe = max(elem_bytes, 4)                # stats pass upcasts to f32
    best = 128
    t = 128
    while t <= S:
        if S % t == 0 and C * t * bpe <= _TILE_BUDGET_BYTES:
            best = t
        t += 128
    return best


def _stats_kernel(x_ref, sum_ref, ssq_ref):
    """Pass 1: accumulate per-channel sum and sum-of-squares.

    x_ref: (1, C, TS); sum_ref/ssq_ref: (1, C) f32, resident across the whole grid.
    """
    @pl.when(jnp.logical_and(pl.program_id(0) == 0, pl.program_id(1) == 0))
    def _():
        sum_ref[...] = jnp.zeros_like(sum_ref)
        ssq_ref[...] = jnp.zeros_like(ssq_ref)

    x = x_ref[...].astype(jnp.float32)            # (1, C, TS)
    sum_ref[...] += jnp.sum(x, axis=2)            # lane (XLU) reduce -> (1, C)
    ssq_ref[...] += jnp.sum(x * x, axis=2)


def _affine_kernel(x_ref, scale_ref, shift_ref, o_ref):
    """Pass 2: out = scale * x + shift (per (n, c), broadcast over lanes)."""
    # x_ref/o_ref: (1, C, TS); scale_ref/shift_ref: (1, C, 1) f32.
    o_ref[...] = (scale_ref[...] * x_ref[...] + shift_ref[...]).astype(o_ref.dtype)


def conditional_norm(x_nchw, cls_idx, embed_weight):
    """x_nchw: (N, C, H, W); cls_idx: (N,) int32; embed_weight: (num_classes, 2C)."""
    N, C, H, W = x_nchw.shape
    S = H * W
    x = x_nchw.reshape(N, C, S)                   # contiguous view: H*W on the lane axis
    ts = _spatial_tile(S, C, x.dtype.itemsize)
    grid = (N, S // ts)

    # ---- Pass 1: per-channel batch statistics (training-mode BatchNorm2d) ----
    sums, ssqs = pl.pallas_call(
        _stats_kernel,
        out_shape=(jax.ShapeDtypeStruct((1, C), jnp.float32),
                   jax.ShapeDtypeStruct((1, C), jnp.float32)),
        grid=grid,
        in_specs=[pl.BlockSpec((1, C, ts), lambda n, s: (n, 0, s))],
        out_specs=(pl.BlockSpec((1, C), lambda n, s: (0, 0)),
                   pl.BlockSpec((1, C), lambda n, s: (0, 0))),
        compiler_params=pltpu.CompilerParams(
            dimension_semantics=("arbitrary", "arbitrary"),
            vmem_limit_bytes=_VMEM_LIMIT_BYTES),
    )(x)

    # ---- Tiny per-(n, c) glue in plain JAX: fold stats + conditional gamma/beta ----
    # scale = gamma * rsqrt(var + eps), shift = beta - mean * scale
    count = jnp.float32(N * S)
    mean = sums[0] / count                                         # (C,)
    var = jnp.maximum(ssqs[0] / count - mean * mean, 0.0)          # biased variance (training BN)
    inv_std = jax.lax.rsqrt(var + EPS)

    gb = jnp.take(embed_weight, cls_idx, axis=0).astype(jnp.float32)  # (N, 2C) embedding lookup
    gamma, beta = gb[:, :C], gb[:, C:]
    scale = gamma * inv_std[None, :]                               # (N, C)
    shift = beta - mean[None, :] * scale                           # (N, C)
    scale = scale.reshape(N, C, 1)
    shift = shift.reshape(N, C, 1)

    # ---- Pass 2: stream x again, single FMA per element, lane-dense stores ----
    out = pl.pallas_call(
        _affine_kernel,
        out_shape=jax.ShapeDtypeStruct((N, C, S), x_nchw.dtype),
        grid=grid,
        in_specs=[
            pl.BlockSpec((1, C, ts), lambda n, s: (n, 0, s)),
            pl.BlockSpec((1, C, 1), lambda n, s: (n, 0, 0)),
            pl.BlockSpec((1, C, 1), lambda n, s: (n, 0, 0)),
        ],
        out_specs=pl.BlockSpec((1, C, ts), lambda n, s: (n, 0, s)),
        compiler_params=pltpu.CompilerParams(
            dimension_semantics=("parallel", "parallel"),
            vmem_limit_bytes=_VMEM_LIMIT_BYTES),
    )(x, scale, shift)

    return out.reshape(N, C, H, W)


def conditional_norm_ref(x_nchw, cls_idx, embed_weight):
    """Pure-JAX reference matching PyTorch training-mode BatchNorm2d + conditional affine."""
    N, C, H, W = x_nchw.shape
    mean = jnp.mean(x_nchw, axis=(0, 2, 3), keepdims=True)
    var = jnp.mean((x_nchw - mean) ** 2, axis=(0, 2, 3), keepdims=True)
    x_hat = (x_nchw - mean) / jnp.sqrt(var + EPS)
    gb = embed_weight[cls_idx]
    gamma = gb[:, :C][:, :, None, None]
    beta = gb[:, C:][:, :, None, None]
    return gamma * x_hat + beta


if __name__ == "__main__":
    N, C, H, W = 2, 4, 16, 16
    num_classes = 10

    key = jax.random.PRNGKey(0)
    kx, kp = jax.random.split(key)

    x = jax.random.normal(kx, (N, C, H, W), dtype=jnp.float32)
    cls_idx = jnp.array([1, 3], dtype=jnp.int32)

    # Deterministic parameter init per module __init__:
    #   embed.weight[:, :C] = 1, embed.weight[:, C:] = 0
    embed_weight = jnp.concatenate(
        [jnp.ones((num_classes, C), jnp.float32),
         jnp.zeros((num_classes, C), jnp.float32)],
        axis=1,
    )

    out = jax.block_until_ready(conditional_norm(x, cls_idx, embed_weight))
    ref = conditional_norm_ref(x, cls_idx, embed_weight)
    assert out.shape == (N, C, H, W)
    assert jnp.allclose(out, ref, atol=1e-4, rtol=1e-4)

    # Extra check: exercise the per-sample gamma/beta path with non-trivial weights.
    embed_weight2 = embed_weight + 0.1 * jax.random.normal(
        kp, (num_classes, 2 * C), dtype=jnp.float32
    )
    out2 = jax.block_until_ready(conditional_norm(x, cls_idx, embed_weight2))
    ref2 = conditional_norm_ref(x, cls_idx, embed_weight2)
    assert jnp.allclose(out2, ref2, atol=1e-4, rtol=1e-4)

    print("KERNEL_OK")
</pallas_src>

<mosaic_0001>
module attributes {stable_mosaic.version = 11 : i64} {
  func.func @_stats_kernel(%arg0: i32, %arg1: i32, %arg2: memref<1x4x256xf32, #tpu.memory_space<vmem>>, %arg3: memref<1x4xf32, #tpu.memory_space<vmem>>, %arg4: memref<1x4xf32, #tpu.memory_space<vmem>>) attributes {dimension_semantics = [#tpu.dimension_semantics<arbitrary>, #tpu.dimension_semantics<arbitrary>], iteration_bounds = array<i64: 2, 1>, scalar_prefetch = 0 : i64, scratch_operands = 0 : i64, tpu.core_type = #tpu.core_type<tc>, window_params = [{transform_indices = @transform_0, window_bounds = array<i64: 1, 4, 256>}, {pipeline_mode = #tpu.pipeline_mode<synchronous>, transform_indices = @transform_1, window_bounds = array<i64: 1, 4>}, {pipeline_mode = #tpu.pipeline_mode<synchronous>, transform_indices = @transform_2, window_bounds = array<i64: 1, 4>}]} {
    %c0_i32 = arith.constant 0 : i32
    %0 = arith.cmpi eq, %arg0, %c0_i32 : i32
    %c0_i32_0 = arith.constant 0 : i32
    %1 = arith.cmpi eq, %arg1, %c0_i32_0 : i32
    %2 = arith.andi %0, %1 : i1
    %3 = arith.extui %2 : i1 to i32
    %c0_i32_1 = arith.constant 0 : i32
    %4 = arith.cmpi ne, %3, %c0_i32_1 : i32
    scf.if %4 {
      %cst_13 = arith.constant 0.000000e+00 : f32
      %15 = vector.broadcast %cst_13 : f32 to vector<1x4xf32>
      %c0_14 = arith.constant 0 : index
      %c0_15 = arith.constant 0 : index
      %16 = vector.load %arg3[%c0_14, %c0_15] : memref<1x4xf32, #tpu.memory_space<vmem>>, vector<1x4xf32>
      tpu.vector_store %arg3[%c0_14, %c0_15], %15 {strides = array<i32>} : memref<1x4xf32, #tpu.memory_space<vmem>>, vector<1x4xf32>,
      %cst_16 = arith.constant 0.000000e+00 : f32
      %17 = vector.broadcast %cst_16 : f32 to vector<1x4xf32>
      %c0_17 = arith.constant 0 : index
      %c0_18 = arith.constant 0 : index
      %18 = vector.load %arg4[%c0_17, %c0_18] : memref<1x4xf32, #tpu.memory_space<vmem>>, vector<1x4xf32>
      tpu.vector_store %arg4[%c0_17, %c0_18], %17 {strides = array<i32>} : memref<1x4xf32, #tpu.memory_space<vmem>>, vector<1x4xf32>,
    } else {
    }
    %c0 = arith.constant 0 : index
    %c0_2 = arith.constant 0 : index
    %c0_3 = arith.constant 0 : index
    %5 = vector.load %arg2[%c0, %c0_2, %c0_3] : memref<1x4x256xf32, #tpu.memory_space<vmem>>, vector<1x4x256xf32>
    %c0_4 = arith.constant 0 : index
    %c0_5 = arith.constant 0 : index
    %6 = vector.load %arg3[%c0_4, %c0_5] : memref<1x4xf32, #tpu.memory_space<vmem>>, vector<1x4xf32>
    %cst = arith.constant dense<0.000000e+00> : vector<1x4xf32>
    %7 = vector.multi_reduction <add>, %5, %cst [2] : vector<1x4x256xf32> to vector<1x4xf32>
    %8 = arith.addf %6, %7 : vector<1x4xf32>
    %c0_6 = arith.constant 0 : index
    %c0_7 = arith.constant 0 : index
    %9 = vector.load %arg3[%c0_6, %c0_7] : memref<1x4xf32, #tpu.memory_space<vmem>>, vector<1x4xf32>
    tpu.vector_store %arg3[%c0_6, %c0_7], %8 {strides = array<i32>} : memref<1x4xf32, #tpu.memory_space<vmem>>, vector<1x4xf32>,
    %c0_8 = arith.constant 0 : index
    %c0_9 = arith.constant 0 : index
    %10 = vector.load %arg4[%c0_8, %c0_9] : memref<1x4xf32, #tpu.memory_space<vmem>>, vector<1x4xf32>
    %11 = arith.mulf %5, %5 : vector<1x4x256xf32>
    %cst_10 = arith.constant dense<0.000000e+00> : vector<1x4xf32>
    %12 = vector.multi_reduction <add>, %11, %cst_10 [2] : vector<1x4x256xf32> to vector<1x4xf32>
    %13 = arith.addf %10, %12 : vector<1x4xf32>
    %c0_11 = arith.constant 0 : index
    %c0_12 = arith.constant 0 : index
    %14 = vector.load %arg4[%c0_11, %c0_12] : memref<1x4xf32, #tpu.memory_space<vmem>>, vector<1x4xf32>
    tpu.vector_store %arg4[%c0_11, %c0_12], %13 {strides = array<i32>} : memref<1x4xf32, #tpu.memory_space<vmem>>, vector<1x4xf32>,
    return
  }
  func.func @transform_0(%arg0: i32, %arg1: i32) -> (i32, i32, i32) {
    %c0_i32 = arith.constant 0 : i32
    %c0_i32_0 = arith.constant 0 : i32
    return %arg0, %c0_i32, %arg1 : i32, i32, i32
  }
  func.func @transform_1(%arg0: i32, %arg1: i32) -> (i32, i32) {
    %c0_i32 = arith.constant 0 : i32
    %c0_i32_0 = arith.constant 0 : i32
    %c0_i32_1 = arith.constant 0 : i32
    return %c0_i32, %c0_i32_0 : i32, i32
  }
  func.func @transform_2(%arg0: i32, %arg1: i32) -> (i32, i32) {
    %c0_i32 = arith.constant 0 : i32
    %c0_i32_0 = arith.constant 0 : i32
    %c0_i32_1 = arith.constant 0 : i32
    return %c0_i32, %c0_i32_0 : i32, i32
  }
}

</mosaic_0001>

<bundles_post_ra>
// kernel: tpu_custom_call.1
= control target key start
LH: loop header
LB: loop body
LE: loop exit
PB: predicated region body
PF: predicated region fallthrough
CT: control target
= control target key end

     0   :  { %8 = vsyncpa [#allocation3], 0  ;;  %s848_s0 = inlined_call_operand.hbm [shape: f32[2,4,256], index: 0, kind: input, shape index: {}]   ;;  %s849_s1 = inlined_call_operand.hbm [shape: f32[1,4], index: 1, kind: output, shape index: {0}]   ;;  %s850_s2 = inlined_call_operand.hbm [shape: f32[1,4], index: 2, kind: output, shape index: {1}]  }
   0x1   :  { %10 = vsyncpa [#allocation3 + $0x1], 0 }
   0x2   :  { %11 = vsyncpa [#allocation4], 0 }
   0x3   :  { %12 = vsyncpa [#allocation7], 0  ;;  %s673_s9 = smov 0   ;;  %s675_s10 = smov 0  }
   0x4   :  { %s677_s11 = smov 0   ;;  %s679_s12 = smov 0  }
   0x5   :  { %s681_s13 = smov 0   ;;  %s683_s14 = smov 0  }
   0x6 LB: > { %s418_s15 = sadd.s32 4294967295, %s650_s14   ;;  %s30_s16 = sadd.s32 1, %s646_s13  ;;  %s650_s14 = sphi %s683_s14, %s18_s14   ;;  %s646_s13 = sphi %s681_s13, %s861_s13   ;;  %s642_s12 = sphi %s679_s12, %s860_s12   ;;  %s638_s11 = sphi %s677_s11, %s859_s11   ;;  %s634_s10 = sphi %s675_s10, %s858_s10   ;;  %s630_s9 = sphi %s673_s9, %s857_s9  }
   0x7   : > { %p32_p0 = scmp.ge.s32.totalorder %s30_s16, 2  ;;  %s39_s17 = sadd.s32 1, %s638_s11 }
   0x8   : > { %p46_p1 = scmp.ne.s32.totalorder %s638_s11, %s634_s10  ;;  %p47_p2 = scmp.eq.s32.totalorder %s650_s14, 0 }
   0x9   : > { %s863_s16 = smov (%p32_p0, %s30_s16), 0  ;;  %p52_p4 = scmp.ne.s32.totalorder %s634_s10, %s630_s9 }
   0xa   : > { %p709_p3 = por %p47_p2, %p46_p1  ;;  %s34_s19 = ssub.s32 %s646_s13, %s863_s16 }
   0xb   : > { %p53_p5 = scmp.eq.s32.totalorder %s418_s15, 0  ;;  %p37_p6 = scmp.eq.s32.totalorder %s34_s19, 0 }
   0xc   : > { %p449_p8 = scmp.lt.s32.totalorder %s650_s14, 2  ;;  %s118_s22 = sand.u32 1, %s638_s11  }
   0xd   : > { %p718_p7 = por %p53_p5, %p52_p4  ;;  %s433_s23 = sshll.u32 %s646_s13, 7 }
   0xe   : > { %s724_s21 = scalar_select %p37_p6, %s638_s11, %s39_s17  }
   0xf   : > { %s421_s24 = sshll.u32 %s118_s22, 3  ;;  %s731_s27 = scalar_lea.hbm %s848_s0, %s433_s23 }
  0x10   : > { %s122_s28 = scalar_lea.vmem [#allocation2], %s421_s24  ;;  %p735_p9 = pnand %p449_p8, %p709_p3 }
  0x11   : > { %s132_s29 = sshll.u32 %s122_s28, 4  ;;  %s119_s3 = scalar_lea.sflag [#allocation3], %s118_s22  ;;  %s739_s29 = int_to_ptr.vmem [resolvable:$true] %s132_s29 }
  0x12   : > { %s510_s4 = scalar_lea.hbm %s731_s27, 128  ;;  %p512_p13 = pneg %p735_p9 }
  0x13   : > { %p511_p12 = scmp.ne.s32.totalorder %s731_s27, %s510_s4  ;;  %s515_s7 = scalar_lea.hbm %s848_s0, 256 }
  0x14   : > { %p516_p2 = scmp.lt.u32.totalorder %s731_s27, %s848_s0  ;;  %p517_p3 = scmp.lt.u32.totalorder %s515_s7, %s510_s4 }
  0x15   : > { %p513_p0 = pnand %p512_p13, %p511_p12  ;;  %p519_p5 = scmp.lt.u32.totalorder %s510_s4, %s731_s27 }
  0x16   : > { %p518_p4 = por %p517_p3, %p516_p2 }
  0x17   : > { %p514_p1 = pneg %p513_p0 }
  0x18   : > { %p520_p6 = por %p519_p5, %p518_p4 }
  0x1a   : > { %p521_p8 = pnand %p520_p6, %p514_p1 }
  0x1c   : > { %524 = shalt.err (!%p521_p8)
}
  0x1d   : > { %s525_s17 = scalar_lea.vmem %s739_s29, 128  ;;  %s652_s18 = smov [#allocation2]  }
  0x1e   : > { %p526_p12 = scmp.ne.s32.totalorder %s739_s29, %s525_s17  ;;  %s530_s19 = sshll.u32 %s652_s18, 4  ;;  %s531_s19 = int_to_ptr.vmem [resolvable:$false] %s530_s19 }
  0x1f   : > { %s532_s22 = scalar_lea.vmem %s531_s19, 256  ;;  %p533_p11 = scmp.lt.s32.totalorder %s739_s29, %s531_s19 }
  0x20   : > { %p528_p0 = pnand %p526_p12, %p512_p13  ;;  %p534_p2 = scmp.lt.s32.totalorder %s532_s22, %s525_s17 }
  0x22   : > { %p529_p10 = pneg %p528_p0  ;;  %p535_p3 = por %p534_p2, %p533_p11 }
  0x24   : > { %p536_p4 = pnand %p535_p3, %p529_p10 }
  0x26   : > { %539 = shalt.err (!%p536_p4)
}
  0x27   : > { %448 = dma.hbm_to_vmem [thread:$0]  (!%p735_p9), %s731_s27, 128, %s739_s29, %s119_s3  }
  0x28   : > { %p854_p1 = scmp.lt.s32.totalorder %s650_s14, 3  ;;  %p855_p5 = scmp.ge.s32.totalorder %s650_s14, 1 }
  0x2a   : > { %p138_p13 = pnand %p855_p5, %p854_p1 }
  0x2b   : > { %s143_s23 = sand.u32 (!%p138_p13), 1, %s634_s10  }
  0x2c   : > { %141 = sbr.rel (%p138_p13) target bundleno = 394 (0x18a), region = 24  ;;  %s425_s24 = sshll.u32 (!%p138_p13), %s143_s23, 3 }
  0x2d   : > { %s144_s25 = scalar_lea.sflag (!%p138_p13), [#allocation3], %s143_s23  ;;  %s147_s26 = scalar_lea.vmem (!%p138_p13), [#allocation2], %s425_s24 }
  0x33   : > { %617 = dma.done.wait (%p718_p7), %s144_s25, 128  }
  0x34   : > { %619 = vsyncadd (%p718_p7), %s144_s25, 4294967168  ;;  %p164_p10 = scmp.eq.s32.totalorder %s642_s12, 0 }
  0x35   : > { %vm170_vm0 = vcmask (%p164_p10), 24576   ;;  %v653_v0 = vmov (%p164_p10), 0.0  }
  0x36   : > { %169 = sbr.rel (!%p164_p10) target bundleno = 61 (0x3d), region = 32  ;;  %171 = vst.msk [vmem:[#allocation5] sm:$0x1] (%p164_p10), %vm170_vm0, %v653_v0  ;;  %172 = vst.msk [vmem:[#allocation6] sm:$0x1] (%p164_p10), %vm170_vm0, %v653_v0 }
  0x3d PF: > { %v173_v1 = vld [vmem:[%s147_s26] sm:$0xff]  ;;  %vm178_vm1 = vcmask 1043456   ;;  %v654_v11 = vmov 0   ;;  %v185_v12 = vlaneseq  ;;  %v655_v16 = vmov 1966171168   ;;  %s656_s12 = smov [#allocation5]  }
  0x3e   : > { %v176_v2 = vcombine.high %v173_v1, %v173_v1  ;;  %v179_v3 = vsel %vm178_vm1, %v173_v1, 0.0  ;;  %v253_v4 = vmul.f32 %v173_v1, %v173_v1  ;;  %507 = vset.pattern.permute.xlu1 %v654_v11  ;;  %508 = vset.pattern.permute.xlu0 %v654_v11  ;;  %v204_v17 = vunpack.c.l.s4 %v655_v16  ;;  %v174_v50 = vld [vmem:[#allocation5] sm:$0x1]  ;;  %s334_s20 = sshll.u32 %s656_s12, 4  ;;  %p780_p7 = scmp.eq.s32.totalorder %s418_s15, 1  ;;  %s335_s20 = int_to_ptr.vmem [resolvable:$true] %s334_s20 }
  0x3f   : > { %v186_v13 = vshrl.u32 %v185_v12, 7  ;;  %v229_v14 = vand.u32 127, %v185_v12  ;;  %vm250_vm2 = vcmask 24576   ;;  %v252_v55 = vld [vmem:[#allocation6] sm:$0x1]  ;;  %s657_s28 = smov [#allocation6]   ;;  %p547_p8 = scmp.lt.s32.totalorder %s335_s20, %s335_s20 }
  0x40   : > { %v180_v5 = vsel %vm178_vm1, %v176_v2, 0.0  ;;  %v255_v6 = vcombine.high %v253_v4, %v253_v4  ;;  %v257_v7 = vsel %vm178_vm1, %v253_v4, 0.0  ;;  %v205_v22 = vunpack.c.0.s8 %v204_v17  ;;  %s345_s29 = sshll.u32 %s657_s28, 4  ;;  %s540_s30 = scalar_lea.vmem %s335_s20, 16  ;;  %s346_s29 = int_to_ptr.vmem [resolvable:$true] %s345_s29 }
  0x41   : > { %v181_v8 = vadd.f32 %v180_v5, %v179_v3  ;;  %v232_v15 = vsub.s32 %v229_v14, %v186_v13  ;;  %v187_v18 = vsub.s32 0, %v186_v13  ;;  %v191_v19 = vsub.s32 1, %v186_v13  ;;  %p541_p9 = scmp.ne.s32.totalorder %s335_s20, %s540_s30  ;;  %s546_s3 = scalar_lea.vmem %s335_s20, 32 }
  0x42   : > { %v258_v9 = vsel %vm178_vm1, %v255_v6, 0.0  ;;  %v195_v20 = vsub.s32 2, %v186_v13  ;;  %v199_v21 = vsub.s32 3, %v186_v13  ;;  %v208_v28 = vsub.s32 %v205_v22, %v186_v13  ;;  %p548_p12 = scmp.lt.s32.totalorder %s546_s3, %s540_s30 }
  0x43   : > { %182 = vadd.xlane.f32.xlu0 %v181_v8  ;;  %v259_v10 = vadd.f32 %v258_v9, %v257_v7  ;;  %p542_p11 = pnand %p541_p9, %p780_p7 }
  0x44   : > { %p549_p0 = por %p548_p12, %p547_p8 }
  0x45   : > { %p543_p6 = pneg %p542_p11 }
  0x47   : > { %260 = vadd.xlane.f32.xlu0 %v259_v10  ;;  %p550_p2 = pnand %p549_p0, %p543_p6 }
  0xd0   : > { %v183_v23 = vpop.xlane.xlu0 %182 }
  0xd1   : > { %v188_v24 = vrot.slane %v183_v23, %v187_v18  ;;  %v192_v25 = vrot.slane %v183_v23, %v191_v19  ;;  %v196_v26 = vrot.slane %v183_v23, %v195_v20  ;;  %v200_v27 = vrot.slane %v183_v23, %v199_v21 }
  0xd3   : > { %v201_v29 = vcombine.low %v188_v24, %v192_v25  ;;  %v202_v30 = vcombine.low %v196_v26, %v200_v27 }
  0xd4   : > { %v261_v31 = vpop.xlane.xlu0 %260 }
  0xd5   : > { %v266_v32 = vrot.slane %v261_v31, %v187_v18  ;;  %v270_v33 = vrot.slane %v261_v31, %v191_v19  ;;  %v274_v34 = vrot.slane %v261_v31, %v195_v20  ;;  %v278_v35 = vrot.slane %v261_v31, %v199_v21 }
  0xd6   : > { %v209_v36 = vrot.slane %v201_v29, %v208_v28  ;;  %v216_v37 = vrot.slane %v202_v30, %v208_v28 }
  0xd7   : > { %v279_v38 = vcombine.low %v266_v32, %v270_v33  ;;  %v280_v39 = vcombine.low %v274_v34, %v278_v35 }
  0xd8   : > { %v217_v40 = vcombine.low %v209_v36, %v216_v37 }
  0xd9   : > { %v287_v41 = vrot.slane %v279_v38, %v208_v28  ;;  %v294_v42 = vrot.slane %v280_v39, %v208_v28 }
  0xda   : > { %v224_v43 = vrot.slane %v217_v40, %v208_v28 }
  0xdb   : > { %v295_v44 = vcombine.low %v287_v41, %v294_v42 }
  0xdc   : > { %226 = vperm.xlu1 %507, %v224_v43  }
  0xdd   : > { %v302_v45 = vrot.slane %v295_v44, %v208_v28 }
  0xe0   : > { %304 = vperm.xlu1 %507, %v302_v45  }
 0x15b   : > { %v227_v46 = vpop.permute.xlu1 %226 }
 0x15c   : > { %v233_v47 = vrot.slane %v227_v46, %v232_v15 }
 0x15e   : > { %v240_v48 = vrot.slane %v233_v47, %v208_v28 }
 0x15f   : > { %v305_v49 = vpop.permute.xlu1 %304 }
 0x160   : > { %v247_v51 = vrot.slane %v240_v48, %v208_v28  ;;  %v309_v52 = vrot.slane %v305_v49, %v232_v15 }
 0x162   : > { %v316_v53 = vrot.slane %v309_v52, %v208_v28  ;;  %v249_v54 = vadd.f32 %v247_v51, %v174_v50 }
 0x164   : > { %v323_v56 = vrot.slane %v316_v53, %v208_v28  ;;  %251 = vst.msk [vmem:[#allocation5] sm:$0x1] %vm250_vm2, %v249_v54 }
 0x165   : > { %553 = shalt.err (!%p550_p2)
}
 0x166   : > { %s554_s5 = scalar_lea.hbm %s849_s1, 16 }
 0x167   : > { %p555_p3 = scmp.ne.s32.totalorder %s849_s1, %s554_s5  ;;  %p560_p5 = scmp.lt.u32.totalorder %s554_s5, %s849_s1 }
 0x169   : > { %p556_p4 = pnand %p555_p3, %p780_p7 }
 0x16b   : > { %p557_p1 = pneg %p556_p4 }
 0x16d   : > { %p562_p13 = pnand %p560_p5, %p557_p1 }
 0x16f   : > { %565 = shalt.err (!%p562_p13)
}
 0x170   : > { %438 = dma.vmem_to_hbm [thread:$0]  (%p780_p7), %s335_s20, 16, %s849_s1, [#allocation4]   ;;  %v325_v57 = vadd.f32 %v323_v56, %v252_v55 }
 0x171   : > { %s566_s19 = scalar_lea.vmem %s346_s29, 16  ;;  %s572_s22 = scalar_lea.vmem %s346_s29, 32 }
 0x172   : > { %326 = vst.msk [vmem:[#allocation6] sm:$0x1] %vm250_vm2, %v325_v57  ;;  %p567_p10 = scmp.ne.s32.totalorder %s346_s29, %s566_s19  ;;  %p573_p6 = scmp.lt.s32.totalorder %s346_s29, %s346_s29 }
 0x173   : > { %p574_p8 = scmp.lt.s32.totalorder %s572_s22, %s566_s19 }
 0x174   : > { %p568_p9 = pnand %p567_p10, %p780_p7 }
 0x175   : > { %p575_p12 = por %p574_p8, %p573_p6 }
 0x176   : > { %p569_p11 = pneg %p568_p9 }
 0x178   : > { %p576_p0 = pnand %p575_p12, %p569_p11 }
 0x17a   : > { %579 = shalt.err (!%p576_p0)
}
 0x17b   : > { %s580_s25 = scalar_lea.hbm %s850_s2, 16 }
 0x17c   : > { %p581_p2 = scmp.ne.s32.totalorder %s850_s2, %s580_s25  ;;  %p586_p1 = scmp.lt.u32.totalorder %s580_s25, %s850_s2 }
 0x17e   : > { %p582_p3 = pnand %p581_p2, %p780_p7 }
 0x180   : > { %p583_p4 = pneg %p582_p3 }
 0x182   : > { %p588_p5 = pnand %p586_p1, %p583_p4 }
 0x184   : > { %591 = shalt.err (!%p588_p5)
}
 0x185   : > { %440 = dma.vmem_to_hbm [thread:$0]  (%p780_p7), %s346_s29, 16, %s850_s2, [#allocation7]  }
 0x186   : > { %621 = dma.done.wait (%p780_p7), [#allocation4], 16  }
 0x187   : > { %623 = vsyncadd (%p780_p7), [#allocation4], 4294967280 }
 0x188   : > { %625 = dma.done.wait (%p780_p7), [#allocation7], 16  }
 0x189   : > { %627 = vsyncadd (%p780_p7), [#allocation7], 4294967280 }
 0x18a PF: > { %s18_s14 = sadd.s32 1, %s650_s14   ;;  %s857_s9 = smov %s634_s10 }
 0x18b   : > { %p15_p13 = scmp.ge.s32.totalorder %s18_s14, 4   ;;  %s858_s10 = smov %s638_s11 }
 0x18c   : > { %s859_s11 = smov %s724_s21  ;;  %s860_s12 = smov %s646_s13 }
 0x18d   : > { %s861_s13 = smov %s863_s16  ;;  %17 = sbr.rel (!%p15_p13) target bundleno = 6 (0x6), region = 73 }
 0x194   :  { %362 = vsyncpa [#allocation3], 1 }
 0x195   :  { %364 = vsyncpa [#allocation3 + $0x1], 1 }
 0x196   :  { %365 = vsyncpa [#allocation4], 1 }
 0x197   :  { %367 = vsyncpa [#allocation4 + $0x1], 1 }
 0x198   :  { %368 = vsyncpa [#allocation7], 1 }

</bundles_post_ra>
